<compile_context>
chip_gen: v6e
topology: v6e:2x2x1
jax: 0.10.0
libtpu: 0.0.40
codegen_flags: <defaults>
</compile_context>

<pallas_src>
import functools
import math

import jax
import jax.numpy as jnp
from jax.experimental import pallas as pl
from jax.experimental.pallas import tpu as pltpu


def _xlogx(v):
    """v * log(v) with the 0*log(0) := 0 convention (Python floats)."""
    v = float(v)
    return v * math.log(v) if v > 0.0 else 0.0


def _label_smoothing_kernel(tgt_ref, x_ref, out_ref, *, padding_idx, fill,
                            confidence, row_const):
    # x_ref: (TM, V) log-probs in native dtype; upcast only here.
    x = x_ref[...].astype(jnp.float32)          # (TM, V)
    tgt = tgt_ref[...]                           # (TM, 1) int32
    tm, v = x.shape

    col = jax.lax.broadcasted_iota(jnp.int32, (tm, v), 1)
    is_tgt = col == tgt                          # target column per row
    is_pad = col == padding_idx                  # padding column (static)

    # Lane-axis (last dim) reductions first -> (TM, 1) per-row partials.
    x_tgt = jnp.sum(jnp.where(is_tgt, x, 0.0), axis=-1, keepdims=True)
    x_pad = jnp.sum(jnp.where(is_pad, x, 0.0), axis=-1, keepdims=True)
    x_row = jnp.sum(x, axis=-1, keepdims=True)

    # sum_j true_dist[i,j] * x[i,j]
    cross = confidence * x_tgt + fill * (x_row - x_tgt - x_pad)   # (TM, 1)

    # Rows whose target is the padding index contribute 0 (index_fill_ in ref).
    valid = tgt != padding_idx
    row_loss = jnp.where(valid, row_const - cross, jnp.float32(0.0))
    tile_sum = jnp.sum(row_loss)

    # Lane-dense (8, 128) partial-sum slab: value in [0, 0], zeros elsewhere.
    r = jax.lax.broadcasted_iota(jnp.int32, (8, 128), 0)
    l = jax.lax.broadcasted_iota(jnp.int32, (8, 128), 1)
    out_ref[...] = jnp.where((r == 0) & (l == 0), tile_sum, jnp.float32(0.0))


def _choose_tile_rows(n_rows, vocab, itemsize):
    """Pick a row-tile size: multiple of 16, x buffer <= ~10 MiB (double-
    buffered ~20 MiB -> fits v7x's 64 MiB VMEM with headroom), capped at the
    (16-padded) number of rows and at 1024 rows per step."""
    per_row_bytes = max(1, vocab * itemsize)
    budget = 10 * 1024 * 1024
    tm = budget // per_row_bytes
    tm = max(16, (tm // 16) * 16)
    n_pad16 = ((n_rows + 15) // 16) * 16
    tm = min(tm, n_pad16, 1024)
    return int(tm)


def label_smoothing_loss(x, target, *, size, padding_idx, smoothing=0.1,
                         tile_rows=None):
    """x: (N, size) float32/bf16 log-probs; target: (N,) int indices -> scalar."""
    n, v = x.shape
    assert v == size, "x.shape[1] must equal `size`"
    confidence = 1.0 - smoothing
    fill = smoothing / (size - 2)
    # Per-valid-row constant: sum_j true_dist*log(true_dist)
    row_const = _xlogx(confidence) + (size - 2) * _xlogx(fill)

    itemsize = jnp.dtype(x.dtype).itemsize
    tm = int(tile_rows) if tile_rows is not None else _choose_tile_rows(n, v, itemsize)
    num_tiles = int(pl.cdiv(n, tm))
    n_pad = num_tiles * tm

    tgt = target.astype(jnp.int32).reshape(n, 1)
    if n_pad != n:
        # Padded rows get target == padding_idx -> contribute exactly 0.
        x = jnp.pad(x, ((0, n_pad - n), (0, 0)))
        tgt = jnp.pad(tgt, ((0, n_pad - n), (0, 0)), constant_values=padding_idx)

    kernel = functools.partial(
        _label_smoothing_kernel,
        padding_idx=padding_idx,
        fill=float(fill),
        confidence=float(confidence),
        row_const=float(row_const),
    )

    partials = pl.pallas_call(
        kernel,
        out_shape=jax.ShapeDtypeStruct((num_tiles * 8, 128), jnp.float32),
        grid=(num_tiles,),
        in_specs=[
            pl.BlockSpec((tm, 1), lambda i: (i, 0)),   # target slab (int32)
            pl.BlockSpec((tm, v), lambda i: (i, 0)),   # x slab (native dtype)
        ],
        out_specs=pl.BlockSpec((8, 128), lambda i: (i, 0)),
        compiler_params=pltpu.CompilerParams(
            dimension_semantics=("parallel",),         # shards across TCs on v7x
            vmem_limit_bytes=48 * 1024 * 1024,
        ),
    )(tgt, x)
    return jnp.sum(partials)


def _reference_loss(x, target, *, size, padding_idx, smoothing=0.1):
    # pure-JAX reference for sanity checking (mirrors the PyTorch module)
    confidence = 1.0 - smoothing
    n, _ = x.shape
    x = x.astype(jnp.float32)
    td = jnp.full((n, size), smoothing / (size - 2), jnp.float32)
    td = td.at[jnp.arange(n), target].set(confidence)
    td = td.at[:, padding_idx].set(0.0)
    td = jnp.where((target == padding_idx)[:, None], 0.0, td)
    safe = jnp.where(td > 0, td, 1.0)
    return jnp.sum(jnp.where(td > 0, td * (jnp.log(safe) - x), 0.0))


if __name__ == "__main__":
    key = jax.random.PRNGKey(0)
    PAD_IDX = 0

    # --- check 1: small shape, single tile (N padded 8 -> 16) ---------------
    N, SIZE = 8, 32
    k1, k2, k3, k4 = jax.random.split(key, 4)
    logits = jax.random.normal(k1, (N, SIZE), dtype=jnp.float32)
    x = jax.nn.log_softmax(logits, axis=-1)             # KLDivLoss expects log-probs
    target = jax.random.randint(k2, (N,), 0, SIZE, dtype=jnp.int32)
    target = target.at[3].set(PAD_IDX)                  # include a padding row

    loss = label_smoothing_loss(x, target, size=SIZE, padding_idx=PAD_IDX,
                                smoothing=0.1)
    loss = jax.block_until_ready(loss)
    ref = _reference_loss(x, target, size=SIZE, padding_idx=PAD_IDX, smoothing=0.1)
    assert jnp.allclose(loss, ref, rtol=1e-5, atol=1e-4), (loss, ref)

    # --- check 2: multi-tile path + row padding (N=40, forced TM=16) --------
    N2, SIZE2 = 40, 32
    logits2 = jax.random.normal(k3, (N2, SIZE2), dtype=jnp.float32)
    x2 = jax.nn.log_softmax(logits2, axis=-1)
    target2 = jax.random.randint(k4, (N2,), 0, SIZE2, dtype=jnp.int32)
    target2 = target2.at[5].set(PAD_IDX)

    loss2 = label_smoothing_loss(x2, target2, size=SIZE2, padding_idx=PAD_IDX,
                                 smoothing=0.1, tile_rows=16)
    loss2 = jax.block_until_ready(loss2)
    ref2 = _reference_loss(x2, target2, size=SIZE2, padding_idx=PAD_IDX, smoothing=0.1)
    assert jnp.allclose(loss2, ref2, rtol=1e-5, atol=1e-4), (loss2, ref2)

    print("KERNEL_OK")
</pallas_src>

<mosaic_0001>
module attributes {stable_mosaic.version = 11 : i64} {
  func.func @_label_smoothing_kernel(%arg0: i32, %arg1: memref<16x1xi32, #tpu.memory_space<vmem>>, %arg2: memref<16x32xf32, #tpu.memory_space<vmem>>, %arg3: memref<8x128xf32, #tpu.memory_space<vmem>>) attributes {dimension_semantics = [#tpu.dimension_semantics<parallel>], iteration_bounds = array<i64: 1>, scalar_prefetch = 0 : i64, scratch_operands = 0 : i64, tpu.core_type = #tpu.core_type<tc>, window_params = [{transform_indices = @transform_0, window_bounds = array<i64: 16, 1>}, {transform_indices = @transform_1, window_bounds = array<i64: 16, 32>}, {transform_indices = @transform_2, window_bounds = array<i64: 8, 128>}]} {
    %c0 = arith.constant 0 : index
    %c0_0 = arith.constant 0 : index
    %0 = vector.load %arg2[%c0, %c0_0] : memref<16x32xf32, #tpu.memory_space<vmem>>, vector<16x32xf32>
    %c0_1 = arith.constant 0 : index
    %c0_2 = arith.constant 0 : index
    %1 = vector.load %arg1[%c0_1, %c0_2] : memref<16x1xi32, #tpu.memory_space<vmem>>, vector<16x1xi32>
    %2 = tpu.iota {dimensions = array<i32: 1>} : vector<16x32xi32>
    %3 = vector.broadcast %1 : vector<16x1xi32> to vector<16x32xi32>
    %4 = arith.cmpi eq, %2, %3 : vector<16x32xi32>
    %c0_i32 = arith.constant 0 : i32
    %5 = vector.broadcast %c0_i32 : i32 to vector<16x32xi32>
    %6 = arith.cmpi eq, %2, %5 : vector<16x32xi32>
    %cst = arith.constant 0.000000e+00 : f32
    %7 = vector.broadcast %cst : f32 to vector<16x32xf32>
    %8 = arith.select %4, %0, %7 : vector<16x32xi1>, vector<16x32xf32>
    %cst_3 = arith.constant dense<0.000000e+00> : vector<16xf32>
    %9 = vector.multi_reduction <add>, %8, %cst_3 [1] : vector<16x32xf32> to vector<16xf32>
    %10 = vector.shape_cast %9 : vector<16xf32> to vector<16x1xf32>
    %cst_4 = arith.constant 0.000000e+00 : f32
    %11 = vector.broadcast %cst_4 : f32 to vector<16x32xf32>
    %12 = arith.select %6, %0, %11 : vector<16x32xi1>, vector<16x32xf32>
    %cst_5 = arith.constant dense<0.000000e+00> : vector<16xf32>
    %13 = vector.multi_reduction <add>, %12, %cst_5 [1] : vector<16x32xf32> to vector<16xf32>
    %14 = vector.shape_cast %13 : vector<16xf32> to vector<16x1xf32>
    %cst_6 = arith.constant dense<0.000000e+00> : vector<16xf32>
    %15 = vector.multi_reduction <add>, %0, %cst_6 [1] : vector<16x32xf32> to vector<16xf32>
    %16 = vector.shape_cast %15 : vector<16xf32> to vector<16x1xf32>
    %cst_7 = arith.constant 0.899999976 : f32
    %17 = vector.broadcast %cst_7 : f32 to vector<16x1xf32>
    %18 = arith.mulf %17, %10 : vector<16x1xf32>
    %19 = arith.subf %16, %10 : vector<16x1xf32>
    %20 = arith.subf %19, %14 : vector<16x1xf32>
    %cst_8 = arith.constant 0.00333333341 : f32
    %21 = vector.broadcast %cst_8 : f32 to vector<16x1xf32>
    %22 = arith.mulf %21, %20 : vector<16x1xf32>
    %23 = arith.addf %18, %22 : vector<16x1xf32>
    %c0_i32_9 = arith.constant 0 : i32
    %24 = vector.broadcast %c0_i32_9 : i32 to vector<16x1xi32>
    %25 = arith.cmpi ne, %1, %24 : vector<16x1xi32>
    %cst_10 = arith.constant -0.665202737 : f32
    %26 = vector.broadcast %cst_10 : f32 to vector<16x1xf32>
    %27 = arith.subf %26, %23 : vector<16x1xf32>
    %cst_11 = arith.constant 0.000000e+00 : f32
    %28 = vector.broadcast %cst_11 : f32 to vector<16x1xf32>
    %29 = arith.select %25, %27, %28 : vector<16x1xi1>, vector<16x1xf32>
    %30 = vector.shape_cast %29 : vector<16x1xf32> to vector<1x16x1xf32>
    %cst_12 = arith.constant dense<0.000000e+00> : vector<1xf32>
    %31 = vector.multi_reduction <add>, %30, %cst_12 [1, 2] : vector<1x16x1xf32> to vector<1xf32>
    %32 = vector.shape_cast %31 : vector<1xf32> to vector<1x1x1xf32>
    %33 = vector.extract %32[0, 0, 0] : f32 from vector<1x1x1xf32>
    %34 = tpu.iota {dimensions = array<i32: 0>} : vector<8x128xi32>
    %35 = tpu.iota {dimensions = array<i32: 1>} : vector<8x128xi32>
    %c0_i32_13 = arith.constant 0 : i32
    %36 = vector.broadcast %c0_i32_13 : i32 to vector<8x128xi32>
    %37 = arith.cmpi eq, %34, %36 : vector<8x128xi32>
    %c0_i32_14 = arith.constant 0 : i32
    %38 = vector.broadcast %c0_i32_14 : i32 to vector<8x128xi32>
    %39 = arith.cmpi eq, %35, %38 : vector<8x128xi32>
    %40 = arith.andi %37, %39 : vector<8x128xi1>
    %cst_15 = arith.constant 0.000000e+00 : f32
    %41 = vector.broadcast %33 : f32 to vector<8x128xf32>
    %42 = vector.broadcast %cst_15 : f32 to vector<8x128xf32>
    %43 = arith.select %40, %41, %42 : vector<8x128xi1>, vector<8x128xf32>
    %c0_16 = arith.constant 0 : index
    %c0_17 = arith.constant 0 : index
    %44 = vector.load %arg3[%c0_16, %c0_17] : memref<8x128xf32, #tpu.memory_space<vmem>>, vector<8x128xf32>
    tpu.vector_store %arg3[%c0_16, %c0_17], %43 {strides = array<i32>} : memref<8x128xf32, #tpu.memory_space<vmem>>, vector<8x128xf32>,
    return
  }
  func.func @transform_0(%arg0: i32) -> (i32, i32) {
    %c0_i32 = arith.constant 0 : i32
    %c0_i32_0 = arith.constant 0 : i32
    return %arg0, %c0_i32 : i32, i32
  }
  func.func @transform_1(%arg0: i32) -> (i32, i32) {
    %c0_i32 = arith.constant 0 : i32
    %c0_i32_0 = arith.constant 0 : i32
    return %arg0, %c0_i32 : i32, i32
  }
  func.func @transform_2(%arg0: i32) -> (i32, i32) {
    %c0_i32 = arith.constant 0 : i32
    %c0_i32_0 = arith.constant 0 : i32
    return %arg0, %c0_i32 : i32, i32
  }
}

</mosaic_0001>

<bundles_post_ra>
// kernel: tpu_custom_call.1
= control target key start
LH: loop header
LB: loop body
LE: loop exit
PB: predicated region body
PF: predicated region fallthrough
CT: control target
= control target key end

     0   :  { %vm29_vm0 = vcmask 261120   ;;  %v16_v2 = vlaneseq  ;;  %v127_v3 = vmov 0   ;;  %s170_s0 = inlined_call_operand.vmem [shape: s32[16,1], index: 0, kind: input, shape index: {}]   ;;  %s171_s1 = inlined_call_operand.vmem [shape: f32[16,32], index: 1, kind: input, shape index: {}]   ;;  %s172_s2 = inlined_call_operand.hbm [shape: f32[8,128], index: 2, kind: output, shape index: {}]  }
   0x1   :  { %v14_v0 = vld [vmem:[%s170_s0] sm:$0xff]  ;;  %v13_v1 = vld [vmem:[%s171_s1 + $0x8] sm:$0xff]  ;;  %104 = vset.pattern.permute.xlu0 %v127_v3 }
   0x2   :  { %v47_v4 = vsel %vm29_vm0, %v13_v1, 0.0 }
   0x3   :  { %7 = vsyncpa [#allocation3], 0  ;;  %19 = vperm.xlu0 %104, %v14_v0   ;;  %48 = vadd.xlane.f32.xlu1 %v47_v4  ;;  %v17_v5 = vand.u32 127, %v16_v2  ;;  %v12_v6 = vld [vmem:[%s171_s1] sm:$0xff]  ;;  %v15_v7 = vld [vmem:[%s170_s0 + $0x8] sm:$0xff]  ;;  %vm60_vm4 = vcmp.ne.s32.totalorder %v14_v0, 0 }
   0x4   :  { %v44_v10 = vsel %vm29_vm0, %v12_v6, 0.0  ;;  %vm61_vm5 = vcmp.ne.s32.totalorder %v15_v7, 0  ;;  %vm66_vm6 = vcmask 7168   ;;  %v80_v49 = vshrl.u32 %v16_v2, 7  ;;  %s128_s0 = smov [#allocation2]  }
   0x5   :  { %vm26_vm1 = vcmp.eq.s32.totalorder %v17_v5, 0  ;;  %s92_s1 = sshll.u32 %s128_s0, 4  ;;  %s93_s1 = int_to_ptr.vmem [resolvable:$true] %s92_s1 }
   0x6   :  { %v36_v8 = vsel %vm26_vm1, %v12_v6, 0.0  ;;  %v37_v16 = vsel %vm26_vm1, %v13_v1, 0.0  ;;  %vm81_vm7 = vcmp.eq.s32.totalorder %v80_v49, 0  ;;  %s105_s18 = scalar_lea.vmem %s93_s1, 128  ;;  %p110_p1 = scmp.lt.s32.totalorder %s93_s1, %s93_s1 }
   0x7   :  { %22 = vperm.xlu0 %104, %v15_v7   ;;  %v38_v9 = vsel %vm29_vm0, %v36_v8, 0.0  ;;  %v41_v18 = vsel %vm29_vm0, %v37_v16, 0.0  ;;  %vm82_vm8 = vmand %vm81_vm7, %vm26_vm1  ;;  %p106_p0 = scmp.ne.s32.totalorder %s93_s1, %s105_s18  ;;  %p111_p2 = scmp.lt.s32.totalorder %s105_s18, %s105_s18 }
   0x8   :  { %39 = vadd.xlane.f32.xlu1 %v38_v9 }
   0x9   :  { %p112_p3 = por %p111_p2, %p110_p1 }
   0xb   :  { %p113_p4 = pnand %p112_p3, %p106_p0 }
  0x26   :  { %45 = vadd.xlane.f32.xlu0 %v44_v10 }
  0x7e   :  { %v20_v11 = vpop.permute.xlu0 %19 }
  0x7f   :  { %vm24_vm2 = vcmp.eq.s32.totalorder %v17_v5, %v20_v11 }
  0x80   :  { %v27_v12 = vsel %vm24_vm2, %v12_v6, 0.0 }
  0x81   :  { %v30_v13 = vsel %vm29_vm0, %v27_v12, 0.0 }
  0x82   :  { %v23_v14 = vpop.permute.xlu0 %22  ;;  %31 = vadd.xlane.f32.xlu1 %v30_v13 }
  0x83   :  { %vm25_vm3 = vcmp.eq.s32.totalorder %v17_v5, %v23_v14 }
  0x84   :  { %v28_v15 = vsel %vm25_vm3, %v13_v1, 0.0 }
  0x85   :  { %v33_v17 = vsel %vm29_vm0, %v28_v15, 0.0 }
  0x86   :  { %34 = vadd.xlane.f32.xlu1 %v33_v17 }
  0x8a   :  { %42 = vadd.xlane.f32.xlu1 %v41_v18 }
  0x8c   :  { %v49_v19 = vpop.xlane.xlu1 %48 }
  0x91   :  { %v40_v20 = vpop.xlane.xlu1 %39 }
  0xaf   :  { %v46_v21 = vpop.xlane.xlu0 %45 }
 0x10b   :  { %v32_v22 = vpop.xlane.xlu1 %31 }
 0x10c   :  { %v52_v23 = vsub.f32 %v46_v21, %v32_v22  ;;  %v50_v26 = vmul.f32 0.9, %v32_v22 }
 0x10e   :  { %v54_v24 = vsub.f32 %v52_v23, %v40_v20 }
 0x10f   :  { %v35_v25 = vpop.xlane.xlu1 %34 }
 0x110   :  { %v56_v27 = vmul.f32 0.0033333334, %v54_v24  ;;  %v53_v29 = vsub.f32 %v49_v19, %v35_v25  ;;  %v51_v33 = vmul.f32 0.9, %v35_v25 }
 0x112   :  { %v58_v28 = vadd.f32 %v56_v27, %v50_v26 }
 0x113   :  { %v43_v30 = vpop.xlane.xlu1 %42 }
 0x114   :  { %v55_v31 = vsub.f32 %v53_v29, %v43_v30  ;;  %v62_v32 = vsub.f32 -0.66520274, %v58_v28 }
 0x116   :  { %v57_v34 = vmul.f32 0.0033333334, %v55_v31  ;;  %v64_v37 = vsel %vm60_vm4, %v62_v32, 0.0 }
 0x117   :  { %v67_v39 = vsel %vm66_vm6, %v64_v37, 0.0 }
 0x118   :  { %v59_v35 = vadd.f32 %v57_v34, %v51_v33 }
 0x11a   :  { %v63_v36 = vsub.f32 -0.66520274, %v59_v35 }
 0x11c   :  { %v65_v38 = vsel %vm61_vm5, %v63_v36, 0.0 }
 0x11d   :  { %v68_v40 = vsel %vm66_vm6, %v65_v38, 0.0 }
 0x11e   :  { %v69_v41 = vadd.f32 %v68_v40, %v67_v39 }
 0x120   :  { %70 = vadd.xlane.f32.xlu1 %v69_v41 }
 0x1a9   :  { %v71_v42 = vpop.xlane.xlu1 %70 }
 0x1aa   :  { %v72_v43 = vrot.slane %v71_v42, 4 }
 0x1ac   :  { %v73_v44 = vadd.f32 %v72_v43, %v71_v42 }
 0x1ae   :  { %v74_v45 = vrot.slane %v73_v44, 2 }
 0x1b0   :  { %v75_v46 = vadd.f32 %v74_v45, %v73_v44 }
 0x1b2   :  { %v76_v47 = vrot.slane %v75_v46, 1 }
 0x1b4   :  { %v77_v48 = vadd.f32 %v76_v47, %v75_v46 }
 0x1b6   :  { %100 = vpush %v77_v48 }
 0x1e7   :  { %s101_s17 = spop %100 }
 0x1e8   :  { %v83_v50 = vstv %s101_s17 }
 0x1e9   :  { %v84_v51 = vsel %vm82_vm8, %v83_v50, 0.0 }
 0x1ea   :  { %85 = vst [vmem:[#allocation2] sm:$0xff] %v84_v51 }
 0x1eb   :  { %116 = shalt.err (!%p113_p4)
}
 0x1ec   :  { %95 = dma.vmem_to_hbm [thread:$0]  %s93_s1, 128, %s172_s2, [#allocation3]  }
 0x1ed   :  { %125 = dma.done.wait [#allocation3], 128  }
 0x1ee   :  { %126 = vsyncadd [#allocation3], 4294967168 }
 0x1ef   :  { %99 = vsyncpa [#allocation3], 1 }

</bundles_post_ra>
